<compile_context>
chip_gen: v7x
topology: tpu7x:2x2x1
jax: 0.10.0
libtpu: 0.0.40
codegen_flags: <defaults>
</compile_context>

<pallas_src>
import jax
import jax.numpy as jnp
from jax.experimental import pallas as pl
from jax.experimental.pallas import tpu as pltpu


def _adaptive_weight_sum_kernel(tw_ref, x_ref, o_ref):
    # tw_ref: (1, N) f32 in VMEM  -- train_weight (log-weights)
    # x_ref:  (1, N) f32 in VMEM  -- loss terms
    # o_ref:  (1, 1) f32 in VMEM  -- scalar result slab
    tw = tw_ref[...]                                   # (1, N)
    x = x_ref[...]                                     # (1, N)

    # Numerically stable softmax over the parameter vector, with the
    # normalization folded into a single scalar divide at the end.
    m = jnp.max(tw, axis=-1, keepdims=True)            # (1, 1)
    e = jnp.exp(tw - m)                                 # (1, N)
    num = jnp.sum(x * e, axis=-1, keepdims=True)        # (1, 1)
    den = jnp.sum(e, axis=-1, keepdims=True)            # (1, 1)

    o_ref[...] = num / den                               # exact divide (rtol=1e-5)


def _adaptive_weight_sum_fwd_impl(x: jax.Array, train_weight: jax.Array) -> jax.Array:
    n = x.shape[0]
    tw2d = train_weight.astype(jnp.float32).reshape(1, n)   # free under jit for f32
    x2d = x.astype(jnp.float32).reshape(1, n)

    out = pl.pallas_call(
        _adaptive_weight_sum_kernel,
        out_shape=jax.ShapeDtypeStruct((1, 1), jnp.float32),
        # No grid: whole (tiny) arrays live in VMEM, no pipeline machinery.
        in_specs=[
            pl.BlockSpec(memory_space=pltpu.MemorySpace.VMEM),
            pl.BlockSpec(memory_space=pltpu.MemorySpace.VMEM),
        ],
        out_specs=pl.BlockSpec(memory_space=pltpu.MemorySpace.VMEM),
        # Tell XLA this custom call is trivially cheap so it schedules/overlaps
        # neighboring ops instead of treating it conservatively.
        cost_estimate=pl.CostEstimate(
            flops=4 * n, transcendentals=n, bytes_accessed=8 * n + 4
        ),
    )(tw2d, x2d)
    return out[0, 0]


@jax.custom_vjp
def adaptive_weight_sum(x: jax.Array, train_weight: jax.Array) -> jax.Array:
    """Computes sum(x * softmax(train_weight)) with a Pallas TPU kernel.

    Args:
      x:            (N,) vector of loss terms.
      train_weight: (N,) vector of log-weights (trainable parameter).

    Returns:
      scalar f32, the adaptively weighted sum.
    """
    return _adaptive_weight_sum_fwd_impl(x, train_weight)


def _aws_fwd(x, train_weight):
    out = _adaptive_weight_sum_fwd_impl(x, train_weight)
    return out, (x, train_weight, out)


def _aws_bwd(res, g):
    # Closed-form grads; the backward is tiny so plain jnp is the right tool.
    x, train_weight, out = res
    w = jax.nn.softmax(train_weight.astype(jnp.float32), axis=0)
    dx = g * w
    dtw = g * w * (x.astype(jnp.float32) - out)
    return dx.astype(x.dtype), dtw.astype(train_weight.dtype)


adaptive_weight_sum.defvjp(_aws_fwd, _aws_bwd)


if __name__ == "__main__":
    key = jax.random.PRNGKey(0)
    k1, k2 = jax.random.split(key)

    # Small shape consistent with the module: N individual loss terms.
    N = 8

    # Deterministic "initial_weights" (positive), as __init__ expects;
    # train_weight = log(initial_weights).
    initial_weights = jax.random.uniform(
        k1, (N,), dtype=jnp.float32, minval=0.1, maxval=2.0
    )
    train_weight = jnp.log(initial_weights)

    # Input tensor of loss terms.
    x = jax.random.normal(k2, (N,), dtype=jnp.float32)

    out = adaptive_weight_sum(x, train_weight)
    out = jax.block_until_ready(out)

    # Reference check in plain JAX (same math as the PyTorch forward).
    ref = jnp.sum(x * jax.nn.softmax(train_weight, axis=0))
    assert jnp.allclose(out, ref, rtol=1e-5, atol=1e-6), (out, ref)

    # Gradient check: custom_vjp closed-form grads vs. autodiff of the jnp ref.
    gx, gtw = jax.grad(adaptive_weight_sum, argnums=(0, 1))(x, train_weight)
    rgx, rgtw = jax.grad(
        lambda xx, tw: jnp.sum(xx * jax.nn.softmax(tw, axis=0)), argnums=(0, 1)
    )(x, train_weight)
    assert jnp.allclose(gx, rgx, rtol=1e-5, atol=1e-6)
    assert jnp.allclose(gtw, rgtw, rtol=1e-5, atol=1e-6)

    print("KERNEL_OK")
</pallas_src>

<mosaic_0001>
module attributes {stable_mosaic.version = 11 : i64} {
  func.func @_adaptive_weight_sum_kernel(%arg0: memref<1x8xf32, #tpu.memory_space<vmem>>, %arg1: memref<1x8xf32, #tpu.memory_space<vmem>>, %arg2: memref<1x1xf32, #tpu.memory_space<vmem>>) attributes {dimension_semantics = [], scalar_prefetch = 0 : i64, scratch_operands = 0 : i64, tpu.core_type = #tpu.core_type<tc>} {
    %c0 = arith.constant 0 : index
    %c0_0 = arith.constant 0 : index
    %0 = vector.load %arg0[%c0, %c0_0] : memref<1x8xf32, #tpu.memory_space<vmem>>, vector<1x8xf32>
    %c0_1 = arith.constant 0 : index
    %c0_2 = arith.constant 0 : index
    %1 = vector.load %arg1[%c0_1, %c0_2] : memref<1x8xf32, #tpu.memory_space<vmem>>, vector<1x8xf32>
    %cst = arith.constant dense<0xFF800000> : vector<1xf32>
    %2 = vector.multi_reduction <maximumf>, %0, %cst [1] : vector<1x8xf32> to vector<1xf32>
    %3 = vector.shape_cast %2 : vector<1xf32> to vector<1x1xf32>
    %4 = vector.broadcast %3 : vector<1x1xf32> to vector<1x8xf32>
    %5 = arith.subf %0, %4 : vector<1x8xf32>
    %6 = math.exp %5 : vector<1x8xf32>
    %7 = arith.mulf %1, %6 : vector<1x8xf32>
    %cst_3 = arith.constant dense<0.000000e+00> : vector<1xf32>
    %8 = vector.multi_reduction <add>, %7, %cst_3 [1] : vector<1x8xf32> to vector<1xf32>
    %9 = vector.shape_cast %8 : vector<1xf32> to vector<1x1xf32>
    %cst_4 = arith.constant dense<0.000000e+00> : vector<1xf32>
    %10 = vector.multi_reduction <add>, %6, %cst_4 [1] : vector<1x8xf32> to vector<1xf32>
    %11 = vector.shape_cast %10 : vector<1xf32> to vector<1x1xf32>
    %12 = arith.divf %9, %11 : vector<1x1xf32>
    %c0_5 = arith.constant 0 : index
    %c0_6 = arith.constant 0 : index
    %13 = vector.load %arg2[%c0_5, %c0_6] : memref<1x1xf32, #tpu.memory_space<vmem>>, vector<1x1xf32>
    tpu.vector_store %arg2[%c0_5, %c0_6], %12 {strides = array<i32>} : memref<1x1xf32, #tpu.memory_space<vmem>>, vector<1x1xf32>,
    return
  }
}

</mosaic_0001>

<bundles_post_ra>
// kernel: tpu_custom_call.1
= control target key start
LH: loop header
LB: loop body
LE: loop exit
PB: predicated region body
PF: predicated region fallthrough
CT: control target
= control target key end

     0   :  { %7 = vsyncpa [#allocation3], 0  ;;  %s157_s0 = inlined_call_operand.hbm [shape: f32[1,8], index: 0, kind: input, shape index: {}]   ;;  %s158_s1 = inlined_call_operand.vmem [shape: f32[1,8], index: 1, kind: input, shape index: {}]   ;;  %s159_s2 = inlined_call_operand.hbm [shape: f32[1,1], index: 2, kind: output, shape index: {}]  }
   0x1   :  { %8 = vsyncpa [#allocation4], 0  ;;  %s113_s9 = smov [#allocation2]   ;;  %s65_s13 = scalar_lea.hbm %s157_s0, 16 }
   0x2   :  { %s15_s10 = sshll.u32 %s113_s9, 4  ;;  %p66_p0 = scmp.ne.s32.totalorder %s157_s0, %s65_s13  ;;  %s16_s10 = int_to_ptr.vmem [resolvable:$true] %s15_s10 }
   0x3   :  { %p69_p1 = scmp.lt.u32.totalorder %s65_s13, %s157_s0 }
   0x5   :  { %p71_p2 = pnand %p69_p1, %p66_p0 }
   0x7   :  { %74 = shalt.err (!%p71_p2)
}
   0x8   :  { %s75_s18 = scalar_lea.vmem %s16_s10, 16  ;;  %s79_s19 = scalar_lea.vmem %s16_s10, 32 }
   0x9   :  { %p76_p3 = scmp.ne.s32.totalorder %s16_s10, %s75_s18  ;;  %p80_p4 = scmp.lt.s32.totalorder %s16_s10, %s16_s10 }
   0xa   :  { %p81_p5 = scmp.lt.s32.totalorder %s79_s19, %s75_s18 }
   0xc   :  { %p82_p6 = por %p81_p5, %p80_p4 }
   0xe   :  { %p83_p7 = pnand %p82_p6, %p76_p3 }
  0x10   :  { %86 = shalt.err (!%p83_p7)
}
  0x11   :  { %18 = dma.hbm_to_vmem [thread:$0]  %s157_s0, 16, %s16_s10, [#allocation3]  }
  0x12   :  { %109 = dma.done.wait [#allocation3], 16  }
  0x13   :  { %110 = vsyncadd [#allocation3], 4294967280  ;;  %vm26_vm0 = vcmask 57344   ;;  %v24_v0 = vld [vmem:[#allocation2] sm:$0x1]  ;;  %s114_s0 = smov [#allocation5]  }
  0x14   :  { %v27_v1 = vsel %vm26_vm0, %v24_v0, -inf  ;;  %v25_v5 = vld [vmem:[%s158_s1] sm:$0x1]  ;;  %s50_s24 = sshll.u32 %s114_s0, 4  ;;  %vm42_vm1 = vcmask 0   ;;  %s51_s24 = int_to_ptr.vmem [resolvable:$true] %s50_s24 }
  0x15   :  { %28 = vmax.xlane.f32.xlu0 %v27_v1  ;;  %s87_s25 = scalar_lea.vmem %s51_s24, 16  ;;  %s91_s26 = scalar_lea.vmem %s51_s24, 32 }
  0x16   :  { %p88_p8 = scmp.ne.s32.totalorder %s51_s24, %s87_s25  ;;  %p92_p9 = scmp.lt.s32.totalorder %s51_s24, %s51_s24 }
  0x17   :  { %p93_p10 = scmp.lt.s32.totalorder %s91_s26, %s87_s25 }
  0x19   :  { %p94_p11 = por %p93_p10, %p92_p9 }
  0x1b   :  { %p95_p12 = pnand %p94_p11, %p88_p8 }
  0xa2   :  { %v29_v2 = vpop.xlane.xlu0 %28 }
  0xa3   :  { %v30_v3 = vsub.f32 %v24_v0, %v29_v2 }
  0xa5   :  { %v31_v4 = vmul.f32 1.442695, %v30_v3 }
  0xa7   :  { %61 = vpow2.f32 %v31_v4 }
  0xb1   :  { %v62_v6 = vpop.eup %61 }
  0xb2   :  { %v37_v7 = vsel %vm26_vm0, %v62_v6, 0.0  ;;  %v33_v8 = vmul.f32 %v62_v6, %v25_v5 }
  0xb3   :  { %38 = vadd.xlane.f32.xlu0 %v37_v7 }
  0xb4   :  { %v34_v9 = vsel %vm26_vm0, %v33_v8, 0.0 }
  0xb5   :  { %35 = vadd.xlane.f32.xlu1 %v34_v9 }
 0x140   :  { %v39_v10 = vpop.xlane.xlu0 %38 }
 0x141   :  { %63 = vrcp.f32 %v39_v10 }
 0x142   :  { %v36_v12 = vpop.xlane.xlu1 %35 }
 0x14b   :  { %v64_v11 = vpop.eup %63 }
 0x14c   :  { %v41_v13 = vmul.f32 %v64_v11, %v36_v12 }
 0x14e   :  { %43 = vst.msk [vmem:[#allocation5] sm:$0x1] %vm42_vm1, %v41_v13 }
 0x14f   :  { %98 = shalt.err (!%p95_p12)
}
 0x150   :  { %s99_s28 = scalar_lea.hbm %s159_s2, 16 }
 0x151   :  { %p100_p13 = scmp.ne.s32.totalorder %s159_s2, %s99_s28  ;;  %p103_p0 = scmp.lt.u32.totalorder %s99_s28, %s159_s2 }
 0x153   :  { %p105_p1 = pnand %p103_p0, %p100_p13 }
 0x155   :  { %108 = shalt.err (!%p105_p1)
}
 0x156   :  { %53 = dma.vmem_to_hbm [thread:$0]  %s51_s24, 16, %s159_s2, [#allocation4]  }
 0x157   :  { %111 = dma.done.wait [#allocation4], 16  }
 0x158   :  { %112 = vsyncadd [#allocation4], 4294967280 }
 0x159   :  { %57 = vsyncpa [#allocation3], 1 }
 0x15a   :  { %58 = vsyncpa [#allocation4], 1 }

</bundles_post_ra>
